<compile_context>
chip_gen: v7x
topology: tpu7x:2x2x1
jax: 0.10.0
libtpu: 0.0.40
codegen_flags: <defaults>
</compile_context>

<pallas_src>
import functools

import jax
import jax.numpy as jnp
from jax import lax
from jax.experimental import pallas as pl
from jax.experimental.pallas import tpu as pltpu

_LANE = 128


def _wsl1_kernel(*refs, beta, valid_rows, tile_rows, blocks_per_slice,
                 has_weights, mask_rows):
    if has_weights:
        x_ref, t_ref, w_ref, out_ref, acc_ref = refs
    else:
        x_ref, t_ref, out_ref, acc_ref = refs
        w_ref = None

    p = pl.program_id(0)          # parallel slice
    i = pl.program_id(1)          # row-block within the slice (reduction axis)

    @pl.when(i == 0)
    def _init():
        acc_ref[...] = jnp.zeros_like(acc_ref)

    x = x_ref[...].astype(jnp.float32)
    t = t_ref[...].astype(jnp.float32)

    # torch.where(isnan(target), input, target)  =>  diff == 0 where target is NaN.
    diff = jnp.where(jnp.isnan(t), 0.0, x - t)
    n = jnp.abs(diff)
    if beta < 1e-5:               # static branch, mirrors the PyTorch module
        loss = n
    else:
        loss = jnp.where(n < beta, (0.5 / beta) * n * n, n - 0.5 * beta)

    if has_weights:
        # (tile_rows, 1) sidecar or full (tile_rows, C) weights; VPU broadcast.
        loss = loss * w_ref[...].astype(jnp.float32)

    if mask_rows:
        # Zero out rows belonging to padded / duplicated edge blocks.
        row0 = (p * blocks_per_slice + i) * tile_rows
        rid = row0 + lax.broadcasted_iota(jnp.int32, loss.shape, 0)
        loss = jnp.where(rid < valid_rows, loss, 0.0)

    acc_ref[...] += loss          # pure VALU work each step; kernel stays DMA-bound

    @pl.when(i == pl.num_programs(1) - 1)
    def _finish():
        total = jnp.sum(acc_ref[...])          # single XLU reduce per slice
        out_ref[...] = jnp.broadcast_to(total, out_ref.shape).astype(out_ref.dtype)


def _pick_tile_rows(rows, lane_cols, max_block_elems):
    cap = max(1, max_block_elems // max(1, lane_cols))
    if cap >= rows:
        return rows                       # single block spans all rows (full-dim rule)
    tile = max(8, (cap // 8) * 8)         # partial row tiling must be sublane(8)-aligned
    return rows if tile >= rows else tile


def weighted_smooth_l1_loss(inp, target, weights=None, beta=1.0 / 9.0,
                            tile_rows=1024, num_partials=2):
    """JAX/Pallas equivalent of WeightedSmoothL1Loss.forward (returns scalar mean)."""
    orig_numel = inp.size
    max_block_elems = tile_rows * _LANE   # ~512 KiB f32 per operand block by default

    if weights is not None and weights.ndim == inp.ndim - 1:
        # Per-row (e.g. per-anchor) weights: keep a (rows, C) layout and stream
        # the weights as a (rows, 1) sidecar -> no broadcast_to materialization.
        cols = inp.shape[-1]
        rows = orig_numel // cols
        operands = (inp.reshape(rows, cols),
                    target.reshape(rows, cols),
                    weights.reshape(rows, 1))
        lane_cols = cols
        has_weights = True
    else:
        if weights is not None:
            assert weights.ndim == inp.ndim
        # Elementwise weights (or none): lane-dense (rows, 128) flat view.
        flats = [inp.reshape(-1), target.reshape(-1)]
        if weights is not None:
            flats.append(weights.reshape(-1))
        pad = (-orig_numel) % _LANE
        if pad:
            # TODO(synk): this <128-element zero pad still copies the flat array;
            # it only triggers when numel is not lane-aligned. Padded elements
            # contribute exactly 0 to the sum.
            flats = [jnp.pad(f, (0, pad)) for f in flats]
        rows = (orig_numel + pad) // _LANE
        operands = tuple(f.reshape(rows, _LANE) for f in flats)
        lane_cols = _LANE
        has_weights = weights is not None

    tile_r = _pick_tile_rows(rows, lane_cols, max_block_elems)
    nblocks = -(-rows // tile_r)
    nslices = max(1, min(num_partials, nblocks))
    blocks_per_slice = -(-nblocks // nslices)
    covered_rows = nslices * blocks_per_slice * tile_r
    mask_rows = covered_rows > rows       # partial last block and/or duplicated blocks

    def row_block_map(p, i):
        # Clamp so duplicated edge blocks never DMA out of bounds; their
        # contribution is zeroed by the in-kernel row mask.
        return (jnp.minimum(p * blocks_per_slice + i, nblocks - 1), 0)

    in_specs = [pl.BlockSpec((tile_r, op.shape[1]), row_block_map)
                for op in operands]

    kernel = functools.partial(
        _wsl1_kernel, beta=float(beta), valid_rows=rows, tile_rows=tile_r,
        blocks_per_slice=blocks_per_slice, has_weights=has_weights,
        mask_rows=mask_rows)

    out = pl.pallas_call(
        kernel,
        out_shape=jax.ShapeDtypeStruct((1, nslices * _LANE), jnp.float32),
        grid_spec=pltpu.PrefetchScalarGridSpec(
            num_scalar_prefetch=0,
            grid=(nslices, blocks_per_slice),
            in_specs=in_specs,
            out_specs=pl.BlockSpec((1, _LANE), lambda p, i: (0, p)),
            scratch_shapes=[pltpu.VMEM((tile_r, lane_cols), jnp.float32)],
        ),
        compiler_params=pltpu.CompilerParams(
            dimension_semantics=("parallel", "arbitrary")),
    )(*operands)

    partial_sums = out[0, ::_LANE]        # one scalar per parallel slice
    return jnp.sum(partial_sums) / jnp.float32(orig_numel)


def _reference(inp, target, weights, beta):
    """Pure-JAX reference mirroring the PyTorch module."""
    target = jnp.where(jnp.isnan(target), inp, target)
    n = jnp.abs(inp - target)
    if beta < 1e-5:
        loss = n
    else:
        loss = jnp.where(n < beta, 0.5 * n * n / beta, n - 0.5 * beta)
    if weights is not None:
        if weights.ndim == loss.ndim - 1:
            weights = weights[..., None]
        loss = loss * weights
    return jnp.mean(loss)


if __name__ == "__main__":
    key = jax.random.PRNGKey(0)
    beta = 1.0 / 9.0

    def check(inp, tgt, w, name):
        got = jax.block_until_ready(weighted_smooth_l1_loss(inp, tgt, w, beta=beta))
        ref = _reference(inp, tgt, w, beta)
        assert jnp.allclose(got, ref, rtol=1e-4, atol=1e-6), (name, got, ref)

    # 1) Per-anchor weights (weights.ndim == input.ndim - 1), small shapes.
    B, N, C = 2, 8, 32
    k1, k2, k3, k4, key = jax.random.split(key, 5)
    x = jax.random.normal(k1, (B, N, C), jnp.float32)
    t = jax.random.normal(k2, (B, N, C), jnp.float32)
    t = jnp.where(jax.random.bernoulli(k3, 0.1, (B, N, C)), jnp.nan, t)
    w_anchor = jax.random.uniform(k4, (B, N), jnp.float32)
    check(x, t, w_anchor, "per_anchor")

    # 2) No weights (2-input kernel variant).
    check(x, t, None, "no_weights")

    # 3) Elementwise weights (same rank as input).
    k5, key = jax.random.split(key)
    w_elem = jax.random.uniform(k5, (B, N, C), jnp.float32)
    check(x, t, w_elem, "elementwise")

    # 4) Larger unweighted case -> multi-block grid, parallel slices, row masking.
    k6, k7, k8, key = jax.random.split(key, 4)
    xb = jax.random.normal(k6, (2, 520, 128), jnp.float32)
    tb = jax.random.normal(k7, (2, 520, 128), jnp.float32)
    tb = jnp.where(jax.random.bernoulli(k8, 0.05, tb.shape), jnp.nan, tb)
    check(xb, tb, None, "large_no_weights")

    # 5) Lane-misaligned numel (3*5*7 = 105), weighted and unweighted.
    k9, k10, k11, key = jax.random.split(key, 4)
    xs = jax.random.normal(k9, (3, 5, 7), jnp.float32)
    ts = jax.random.normal(k10, (3, 5, 7), jnp.float32)
    ws = jax.random.uniform(k11, (3, 5), jnp.float32)
    check(xs, ts, ws, "small_per_anchor")
    check(xs, ts, None, "small_no_weights")

    print("KERNEL_OK")
</pallas_src>

<mosaic_0001>
module attributes {stable_mosaic.version = 11 : i64} {
  func.func @_wsl1_kernel(%arg0: i32, %arg1: i32, %arg2: memref<16x32xf32, #tpu.memory_space<vmem>>, %arg3: memref<16x32xf32, #tpu.memory_space<vmem>>, %arg4: memref<16x1xf32, #tpu.memory_space<vmem>>, %arg5: memref<1x128xf32, #tpu.memory_space<vmem>>, %arg6: memref<16x32xf32, #tpu.memory_space<vmem>>) attributes {dimension_semantics = [#tpu.dimension_semantics<parallel>, #tpu.dimension_semantics<arbitrary>], iteration_bounds = array<i64: 1, 1>, scalar_prefetch = 0 : i64, scratch_operands = 1 : i64, tpu.core_type = #tpu.core_type<tc>, window_params = [{transform_indices = @transform_0, window_bounds = array<i64: 16, 32>}, {transform_indices = @transform_1, window_bounds = array<i64: 16, 32>}, {transform_indices = @transform_2, window_bounds = array<i64: 16, 1>}, {transform_indices = @transform_3, window_bounds = array<i64: 1, 128>}]} {
    %c0_i32 = arith.constant 0 : i32
    %0 = arith.cmpi eq, %arg1, %c0_i32 : i32
    %1 = arith.extui %0 : i1 to i32
    %c0_i32_0 = arith.constant 0 : i32
    %2 = arith.cmpi ne, %1, %c0_i32_0 : i32
    scf.if %2 {
      %cst_15 = arith.constant 0.000000e+00 : f32
      %27 = vector.broadcast %cst_15 : f32 to vector<16x32xf32>
      %c0_16 = arith.constant 0 : index
      %c0_17 = arith.constant 0 : index
      %28 = vector.load %arg6[%c0_16, %c0_17] : memref<16x32xf32, #tpu.memory_space<vmem>>, vector<16x32xf32>
      tpu.vector_store %arg6[%c0_16, %c0_17], %27 {strides = array<i32>} : memref<16x32xf32, #tpu.memory_space<vmem>>, vector<16x32xf32>,
    } else {
    }
    %c0 = arith.constant 0 : index
    %c0_1 = arith.constant 0 : index
    %3 = vector.load %arg2[%c0, %c0_1] : memref<16x32xf32, #tpu.memory_space<vmem>>, vector<16x32xf32>
    %c0_2 = arith.constant 0 : index
    %c0_3 = arith.constant 0 : index
    %4 = vector.load %arg3[%c0_2, %c0_3] : memref<16x32xf32, #tpu.memory_space<vmem>>, vector<16x32xf32>
    %5 = arith.cmpf one, %4, %4 : vector<16x32xf32>
    %6 = arith.subf %3, %4 : vector<16x32xf32>
    %cst = arith.constant 0.000000e+00 : f32
    %7 = vector.broadcast %cst : f32 to vector<16x32xf32>
    %8 = arith.select %5, %7, %6 : vector<16x32xi1>, vector<16x32xf32>
    %9 = math.absf %8 : vector<16x32xf32>
    %cst_4 = arith.constant 0.111111112 : f32
    %10 = vector.broadcast %cst_4 : f32 to vector<16x32xf32>
    %11 = arith.cmpf olt, %9, %10 : vector<16x32xf32>
    %cst_5 = arith.constant 4.500000e+00 : f32
    %12 = vector.broadcast %cst_5 : f32 to vector<16x32xf32>
    %13 = arith.mulf %12, %9 : vector<16x32xf32>
    %14 = arith.mulf %13, %9 : vector<16x32xf32>
    %cst_6 = arith.constant 0.055555556 : f32
    %15 = vector.broadcast %cst_6 : f32 to vector<16x32xf32>
    %16 = arith.subf %9, %15 : vector<16x32xf32>
    %17 = arith.select %11, %14, %16 : vector<16x32xi1>, vector<16x32xf32>
    %c0_7 = arith.constant 0 : index
    %c0_8 = arith.constant 0 : index
    %18 = vector.load %arg4[%c0_7, %c0_8] : memref<16x1xf32, #tpu.memory_space<vmem>>, vector<16x1xf32>
    %19 = vector.broadcast %18 : vector<16x1xf32> to vector<16x32xf32>
    %20 = arith.mulf %17, %19 : vector<16x32xf32>
    %c0_9 = arith.constant 0 : index
    %c0_10 = arith.constant 0 : index
    %21 = vector.load %arg6[%c0_9, %c0_10] : memref<16x32xf32, #tpu.memory_space<vmem>>, vector<16x32xf32>
    %22 = arith.addf %21, %20 : vector<16x32xf32>
    %c0_11 = arith.constant 0 : index
    %c0_12 = arith.constant 0 : index
    %23 = vector.load %arg6[%c0_11, %c0_12] : memref<16x32xf32, #tpu.memory_space<vmem>>, vector<16x32xf32>
    tpu.vector_store %arg6[%c0_11, %c0_12], %22 {strides = array<i32>} : memref<16x32xf32, #tpu.memory_space<vmem>>, vector<16x32xf32>,
    %c0_i32_13 = arith.constant 0 : i32
    %24 = arith.cmpi eq, %arg1, %c0_i32_13 : i32
    %25 = arith.extui %24 : i1 to i32
    %c0_i32_14 = arith.constant 0 : i32
    %26 = arith.cmpi ne, %25, %c0_i32_14 : i32
    scf.if %26 {
      %c0_15 = arith.constant 0 : index
      %c0_16 = arith.constant 0 : index
      %27 = vector.load %arg6[%c0_15, %c0_16] : memref<16x32xf32, #tpu.memory_space<vmem>>, vector<16x32xf32>
      %28 = vector.shape_cast %27 : vector<16x32xf32> to vector<1x16x32xf32>
      %cst_17 = arith.constant dense<0.000000e+00> : vector<1xf32>
      %29 = vector.multi_reduction <add>, %28, %cst_17 [1, 2] : vector<1x16x32xf32> to vector<1xf32>
      %30 = vector.shape_cast %29 : vector<1xf32> to vector<1x1x1xf32>
      %31 = vector.extract %30[0, 0, 0] : f32 from vector<1x1x1xf32>
      %32 = vector.broadcast %31 : f32 to vector<1x128xf32>
      %c0_18 = arith.constant 0 : index
      %c0_19 = arith.constant 0 : index
      %33 = vector.load %arg5[%c0_18, %c0_19] : memref<1x128xf32, #tpu.memory_space<vmem>>, vector<1x128xf32>
      tpu.vector_store %arg5[%c0_18, %c0_19], %32 {strides = array<i32>} : memref<1x128xf32, #tpu.memory_space<vmem>>, vector<1x128xf32>,
    } else {
    }
    return
  }
  func.func @transform_0(%arg0: i32, %arg1: i32) -> (i32, i32) {
    %c1_i32 = arith.constant 1 : i32
    %0 = arith.muli %arg0, %c1_i32 : i32
    %1 = arith.addi %0, %arg1 : i32
    %c0_i32 = arith.constant 0 : i32
    %2 = arith.minsi %1, %c0_i32 : i32
    %c0_i32_0 = arith.constant 0 : i32
    %c0_i32_1 = arith.constant 0 : i32
    return %2, %c0_i32_0 : i32, i32
  }
  func.func @transform_1(%arg0: i32, %arg1: i32) -> (i32, i32) {
    %c1_i32 = arith.constant 1 : i32
    %0 = arith.muli %arg0, %c1_i32 : i32
    %1 = arith.addi %0, %arg1 : i32
    %c0_i32 = arith.constant 0 : i32
    %2 = arith.minsi %1, %c0_i32 : i32
    %c0_i32_0 = arith.constant 0 : i32
    %c0_i32_1 = arith.constant 0 : i32
    return %2, %c0_i32_0 : i32, i32
  }
  func.func @transform_2(%arg0: i32, %arg1: i32) -> (i32, i32) {
    %c1_i32 = arith.constant 1 : i32
    %0 = arith.muli %arg0, %c1_i32 : i32
    %1 = arith.addi %0, %arg1 : i32
    %c0_i32 = arith.constant 0 : i32
    %2 = arith.minsi %1, %c0_i32 : i32
    %c0_i32_0 = arith.constant 0 : i32
    %c0_i32_1 = arith.constant 0 : i32
    return %2, %c0_i32_0 : i32, i32
  }
  func.func @transform_3(%arg0: i32, %arg1: i32) -> (i32, i32) {
    %c0_i32 = arith.constant 0 : i32
    %c0_i32_0 = arith.constant 0 : i32
    return %c0_i32, %arg0 : i32, i32
  }
}

</mosaic_0001>

<bundles_post_ra>
// kernel: tpu_custom_call.1
= control target key start
LH: loop header
LB: loop body
LE: loop exit
PB: predicated region body
PF: predicated region fallthrough
CT: control target
= control target key end

     0   :  { %8 = vsyncpa [#allocation4], 0  ;;  %s328_s0 = inlined_call_operand.vmem [shape: f32[16,32], index: 0, kind: input, shape index: {}]   ;;  %s329_s1 = inlined_call_operand.hbm [shape: f32[16,32], index: 1, kind: input, shape index: {}]   ;;  %s330_s2 = inlined_call_operand.vmem [shape: f32[16,1], index: 2, kind: input, shape index: {}]   ;;  %s331_s3 = inlined_call_operand.hbm [shape: f32[1,128], index: 3, kind: output, shape index: {}]  }
   0x1   :  { %9 = vsyncpa [#allocation5], 0  ;;  %s260_s12 = smov [#allocation3]   ;;  %s212_s16 = scalar_lea.hbm %s329_s1, 256 }
   0x2   :  { %s35_s13 = sshll.u32 %s260_s12, 4  ;;  %p213_p0 = scmp.ne.s32.totalorder %s329_s1, %s212_s16  ;;  %s36_s13 = int_to_ptr.vmem [resolvable:$true] %s35_s13 }
   0x3   :  { %p216_p1 = scmp.lt.u32.totalorder %s212_s16, %s329_s1 }
   0x5   :  { %p218_p2 = pnand %p216_p1, %p213_p0 }
   0x7   :  { %221 = shalt.err (!%p218_p2)
}
   0x8   :  { %s222_s21 = scalar_lea.vmem %s36_s13, 256  ;;  %p227_p4 = scmp.lt.s32.totalorder %s36_s13, %s36_s13 }
   0x9   :  { %p223_p3 = scmp.ne.s32.totalorder %s36_s13, %s222_s21  ;;  %p228_p5 = scmp.lt.s32.totalorder %s222_s21, %s222_s21 }
   0xb   :  { %p229_p6 = por %p228_p5, %p227_p4 }
   0xd   :  { %p230_p7 = pnand %p229_p6, %p223_p3 }
   0xf   :  { %233 = shalt.err (!%p230_p7)
}
  0x10   :  { %s261_s22 = smov 128   ;;  %s262_s23 = smov 8  }
  0x11   :  { %41 = dma.hbm_to_vmem [thread:$0]  %s329_s1, 256, %s36_s13, [#allocation4], %s261_s22, %s261_s22, %s262_s23  }
  0x12   :  { %256 = dma.done.wait [#allocation4], 256  }
  0x13   :  { %257 = vsyncadd [#allocation4], 4294967040  ;;  %vm107_vm0 = vcmask 261120   ;;  %v263_v0 = vmov 0   ;;  %v264_v1 = vmov 0.0   ;;  %v132_v2 = vld [vmem:[%s330_s2] sm:$0xff] }
  0x14   :  { %211 = vset.pattern.permute.xlu0 %v263_v0  ;;  %108 = vst.msk [vmem:[#allocation2] sm:$0xff] %vm107_vm0, %v264_v1  ;;  %109 = vst.msk [vmem:[#allocation2 + $0x8] sm:$0xff] %vm107_vm0, %v264_v1  ;;  %v133_v3 = vld [vmem:[%s330_s2 + $0x8] sm:$0xff]  ;;  %v110_v4 = vld [vmem:[%s328_s0] sm:$0xff] }
  0x15   :  { %136 = vperm.xlu0 %211, %v132_v2   ;;  %v112_v5 = vld [vmem:[#allocation3] sm:$0xff]  ;;  %v111_v7 = vld [vmem:[%s328_s0 + $0x8] sm:$0xff]  ;;  %v113_v8 = vld [vmem:[#allocation3 + $0x8] sm:$0xff]  ;;  %s265_s0 = smov [#allocation6]  }
  0x16   :  { %v116_v6 = vsub.f32 %v110_v4, %v112_v5  ;;  %vm114_vm1 = vcmp.ne.f32.partialorder %v112_v5, %v112_v5  ;;  %v117_v10 = vsub.f32 %v111_v7, %v113_v8  ;;  %vm115_vm2 = vcmp.ne.f32.partialorder %v113_v8, %v113_v8  ;;  %s178_s2 = sshll.u32 %s265_s0, 4  ;;  %s179_s2 = int_to_ptr.vmem [resolvable:$true] %s178_s2 }
  0x17   :  { %s234_s7 = scalar_lea.vmem %s179_s2, 16  ;;  %s238_s8 = scalar_lea.vmem %s179_s2, 32 }
  0x18   :  { %v118_v9 = vsel %vm114_vm1, 0.0, %v116_v6  ;;  %v119_v12 = vsel %vm115_vm2, 0.0, %v117_v10  ;;  %p235_p8 = scmp.ne.s32.totalorder %s179_s2, %s234_s7  ;;  %p239_p9 = scmp.lt.s32.totalorder %s179_s2, %s179_s2 }
  0x19   :  { %141 = vperm.xlu0 %211, %v133_v3   ;;  %v120_v11 = vand.u32 2147483647, %v118_v9  ;;  %v121_v14 = vand.u32 2147483647, %v119_v12  ;;  %p240_p10 = scmp.lt.s32.totalorder %s238_s8, %s234_s7 }
  0x1b   :  { %v124_v13 = vmul.f32 4.5, %v120_v11  ;;  %v201_v16 = vadd.f32 -0.055555556, %v120_v11  ;;  %v125_v17 = vmul.f32 4.5, %v121_v14  ;;  %vm122_vm3 = vcmp.lt.f32.partialorder %v120_v11, 0.11111111  ;;  %p241_p11 = por %p240_p10, %p239_p9 }
  0x1c   :  { %v202_v20 = vadd.f32 -0.055555556, %v121_v14  ;;  %vm123_vm4 = vcmp.lt.f32.partialorder %v121_v14, 0.11111111  ;;  %v146_v22 = vld [vmem:[#allocation2] sm:$0xff]  ;;  %v147_v27 = vld [vmem:[#allocation2 + $0x8] sm:$0xff] }
  0x1d   :  { %v126_v15 = vmul.f32 %v124_v13, %v120_v11  ;;  %v127_v19 = vmul.f32 %v125_v17, %v121_v14  ;;  %p242_p12 = pnand %p241_p11, %p235_p8 }
  0x1f   :  { %v130_v18 = vsel %vm122_vm3, %v126_v15, %v201_v16  ;;  %v131_v24 = vsel %vm123_vm4, %v127_v19, %v202_v20 }
  0x94   :  { %v137_v21 = vpop.permute.xlu0 %136 }
  0x95   :  { %v144_v23 = vmul.f32 %v137_v21, %v130_v18 }
  0x97   :  { %v148_v25 = vadd.f32 %v146_v22, %v144_v23 }
  0x98   :  { %v142_v26 = vpop.permute.xlu0 %141 }
  0x99   :  { %151 = vst.msk [vmem:[#allocation2] sm:$0xff] %vm107_vm0, %v148_v25  ;;  %v145_v28 = vmul.f32 %v142_v26, %v131_v24 }
  0x9b   :  { %v149_v29 = vadd.f32 %v147_v27, %v145_v28 }
  0x9d   :  { %152 = vst.msk [vmem:[#allocation2 + $0x8] sm:$0xff] %vm107_vm0, %v149_v29 }
  0xa0   :  { %v156_v30 = vld [vmem:[#allocation2] sm:$0xff] }
  0xa1   :  { %v158_v32 = vsel %vm107_vm0, %v156_v30, 0.0 }
  0xa4   :  { %v157_v31 = vld [vmem:[#allocation2 + $0x8] sm:$0xff] }
  0xa5   :  { %v159_v33 = vsel %vm107_vm0, %v157_v31, 0.0 }
  0xa6   :  { %v160_v34 = vadd.f32 %v159_v33, %v158_v32 }
  0xa8   :  { %161 = vadd.xlane.f32.xlu1 %v160_v34 }
 0x135   :  { %v162_v35 = vpop.xlane.xlu1 %161 }
 0x136   :  { %v163_v36 = vrot.slane %v162_v35, 4 }
 0x138   :  { %v164_v37 = vadd.f32 %v163_v36, %v162_v35 }
 0x13a   :  { %v165_v38 = vrot.slane %v164_v37, 2 }
 0x13c   :  { %v166_v39 = vadd.f32 %v165_v38, %v164_v37 }
 0x13e   :  { %v167_v40 = vrot.slane %v166_v39, 1 }
 0x140   :  { %v168_v41 = vadd.f32 %v167_v40, %v166_v39 }
 0x142   :  { %203 = vpush %v168_v41 }
 0x173   :  { %s204_s6 = spop %203 }
 0x174   :  { %v170_v42 = vstv %s204_s6 }
 0x175   :  { %171 = vst [vmem:[#allocation6] sm:$0x1] %v170_v42 }
 0x176   :  { %245 = shalt.err (!%p242_p12)
}
 0x177   :  { %s246_s11 = scalar_lea.hbm %s331_s3, 16 }
 0x178   :  { %p247_p13 = scmp.ne.s32.totalorder %s331_s3, %s246_s11  ;;  %p250_p0 = scmp.lt.u32.totalorder %s246_s11, %s331_s3 }
 0x17a   :  { %p252_p1 = pnand %p250_p0, %p247_p13 }
 0x17c   :  { %255 = shalt.err (!%p252_p1)
}
 0x17d   :  { %181 = dma.vmem_to_hbm [thread:$0]  %s179_s2, 16, %s331_s3, [#allocation5]  }
 0x17e   :  { %258 = dma.done.wait [#allocation5], 16  }
 0x17f   :  { %259 = vsyncadd [#allocation5], 4294967280 }
 0x180   :  { %185 = vsyncpa [#allocation4], 1 }
 0x181   :  { %186 = vsyncpa [#allocation5], 1 }

</bundles_post_ra>
